<compile_context>
chip_gen: v7x
topology: tpu7x:2x2x1
jax: 0.10.0
libtpu: 0.0.40
codegen_flags: <defaults>
</compile_context>

<pallas_src>
import math

import jax
import jax.numpy as jnp
from jax import lax
from jax.experimental import pallas as pl
from jax.experimental.pallas import tpu as pltpu

TOT_CL = 5
BN_EPS = 2e-5
C_PAD = 128  # lane-dense logits slab width


def _round_up(x, m):
    return ((x + m - 1) // m) * m


def _effective_tk(d_in, tk):
    # Clamp tk to the (128-aligned) input width; keeps tk a multiple of 128.
    return min(tk, _round_up(d_in, 128))


def _make_kernel(d_in, tk, mask_last):
    def kernel(x_ref, w1_ref, g1_ref, be1_ref,
               w2_ref, g2_ref, be2_ref,
               w3_ref, b3_ref,
               out_ref, acc_ref):
        k = pl.program_id(0)

        @pl.when(k == 0)
        def _():
            acc_ref[...] = jnp.zeros_like(acc_ref)

        # ---- fc1 partial: in-kernel bf16 cast, mask the ragged last tile ----
        xt = x_ref[...]
        if mask_last:
            col = k * tk + lax.broadcasted_iota(jnp.int32, xt.shape, 1)
            xt = jnp.where(col < d_in, xt, jnp.zeros_like(xt))
        acc_ref[...] += jnp.dot(xt.astype(jnp.bfloat16), w1_ref[...],
                                preferred_element_type=jnp.float32)

        @pl.when(k == pl.num_programs(0) - 1)
        def _():
            h = acc_ref[...]

            # ---- BN1 (batch stats, biased *centered* variance) + ReLU ----
            # (fc1 bias omitted: it cancels exactly under batch-stat BN.)
            mu = jnp.mean(h, axis=0, keepdims=True)
            d = h - mu
            var = jnp.mean(d * d, axis=0, keepdims=True)
            s = g1_ref[...] * lax.rsqrt(var + BN_EPS)
            t = be1_ref[...] - mu * s
            h = jnp.maximum(h * s + t, 0.0)

            # ---- fc2 (bf16 x bf16 -> f32 on MXU) + BN2 + ReLU ----
            h2 = jnp.dot(h.astype(jnp.bfloat16), w2_ref[...],
                         preferred_element_type=jnp.float32)
            mu2 = jnp.mean(h2, axis=0, keepdims=True)
            d2 = h2 - mu2
            var2 = jnp.mean(d2 * d2, axis=0, keepdims=True)
            s2 = g2_ref[...] * lax.rsqrt(var2 + BN_EPS)
            t2 = be2_ref[...] - mu2 * s2
            h2 = jnp.maximum(h2 * s2 + t2, 0.0)

            # ---- fc3 logits, full f32 (tiny-std init), lane-dense store ----
            out_ref[...] = (jnp.dot(h2, w3_ref[...],
                                    preferred_element_type=jnp.float32)
                            + b3_ref[...])

    return kernel


def net_forward(x, params, *, tk=2048, vmem_limit_bytes=48 * 1024 * 1024):
    """x: [B, D_in] float32 (flattened image).  params: see init_params."""
    B, d_in = x.shape
    w1 = params["w1"]          # (d_pad, H) bf16, pre-padded at init
    w2 = params["w2"]          # (H, H) bf16
    w3 = params["w3_pad"]      # (H, C_PAD) f32, pre-padded at init
    b3 = params["b3_pad"]      # (1, C_PAD) f32
    d_pad, H = w1.shape
    C = params["w3"].shape[1]

    tk = _effective_tk(d_in, tk)
    assert d_pad % tk == 0, (
        "params were initialised with a different tk; got d_pad=%d tk=%d"
        % (d_pad, tk))
    n_k = d_pad // tk
    mask_last = d_pad != d_in   # last K tile is ragged -> mask in-kernel

    resident = dict(pipeline_mode=pl.Buffered(1))  # single-buffer constants

    out = pl.pallas_call(
        _make_kernel(d_in, tk, mask_last),
        out_shape=jax.ShapeDtypeStruct((B, C_PAD), jnp.float32),
        grid_spec=pltpu.PrefetchScalarGridSpec(
            num_scalar_prefetch=0,
            grid=(n_k,),
            in_specs=[
                pl.BlockSpec((B, tk), lambda k: (0, k)),      # x tile (streamed)
                pl.BlockSpec((tk, H), lambda k: (k, 0)),      # w1 tile (streamed)
                pl.BlockSpec((1, H), lambda k: (0, 0), **resident),   # bn1 gamma
                pl.BlockSpec((1, H), lambda k: (0, 0), **resident),   # bn1 beta
                pl.BlockSpec((H, H), lambda k: (0, 0), **resident),   # w2
                pl.BlockSpec((1, H), lambda k: (0, 0), **resident),   # bn2 gamma
                pl.BlockSpec((1, H), lambda k: (0, 0), **resident),   # bn2 beta
                pl.BlockSpec((H, C_PAD), lambda k: (0, 0), **resident),  # w3 pad
                pl.BlockSpec((1, C_PAD), lambda k: (0, 0), **resident),  # b3 pad
            ],
            out_specs=pl.BlockSpec((B, C_PAD), lambda k: (0, 0)),
            scratch_shapes=[pltpu.VMEM((B, H), jnp.float32)],  # fc1 accumulator
        ),
        compiler_params=pltpu.CompilerParams(
            dimension_semantics=("arbitrary",),   # K axis is a reduction
            vmem_limit_bytes=vmem_limit_bytes),
    )(x, w1,
      params["bn1_w"], params["bn1_b"],
      w2, params["bn2_w"], params["bn2_b"],
      w3, b3)

    return out[:, :C]


def init_params(key, d_in, hidden, n_cls, spatial, *, tk=2048):
    """Deterministic init mirroring the PyTorch module's __init__.

    The large weights are stored pre-padded / pre-cast ONCE so the per-call
    wrapper does no HBM-scale work.
    """
    k1, k2, k3 = jax.random.split(key, 3)
    std1 = 0.1 * math.sqrt(2.0 / (spatial * spatial))
    std2 = 0.1 * math.sqrt(2.0 / hidden)
    std3 = 0.0001 * math.sqrt(2.0 / hidden)

    tk_e = _effective_tk(d_in, tk)
    d_pad = _round_up(d_in, tk_e)

    w1 = jax.random.normal(k1, (d_in, hidden), jnp.float32) * std1
    # Permanently pad w1 to a tk multiple (zero rows are exact) + bf16 cast.
    w1 = jnp.pad(w1, ((0, d_pad - d_in), (0, 0))).astype(jnp.bfloat16)

    w3 = jax.random.normal(k3, (hidden, n_cls), jnp.float32) * std3
    b3 = jnp.zeros((1, n_cls), jnp.float32)

    return {
        # Stored as [in, out] (transposed vs PyTorch).
        "w1": w1,                                              # (d_pad, H) bf16
        "b1": jnp.zeros((1, hidden), jnp.float32),   # cancelled by batch-stat BN1
        "w2": (jax.random.normal(k2, (hidden, hidden), jnp.float32)
               * std2).astype(jnp.bfloat16),
        "b2": jnp.zeros((1, hidden), jnp.float32),   # cancelled by batch-stat BN2
        "w3": w3,                                    # unpadded (reference / slicing)
        "b3": b3,
        # Lane-dense fc3 slab, padded once at init.
        "w3_pad": jnp.pad(w3, ((0, 0), (0, C_PAD - n_cls))),
        "b3_pad": jnp.pad(b3, ((0, 0), (0, C_PAD - n_cls))),
        # BatchNorm1d affine params (PyTorch default: weight=1, bias=0)
        "bn1_w": jnp.ones((1, hidden), jnp.float32),
        "bn1_b": jnp.zeros((1, hidden), jnp.float32),
        "bn2_w": jnp.ones((1, hidden), jnp.float32),
        "bn2_b": jnp.zeros((1, hidden), jnp.float32),
    }


def _reference(x, p):
    """Pure-JAX reference matching the kernel's precision choices exactly
    (bf16 matmul inputs, f32 accumulation / centered-variance BN), so the
    check verifies the kernel implementation rather than the bf16 cast."""
    f32 = jnp.float32
    d_in = x.shape[1]
    xb = x.astype(jnp.bfloat16).astype(f32)
    w1 = p["w1"][:d_in].astype(f32)
    w2 = p["w2"].astype(f32)

    h = xb @ w1 + p["b1"]
    mu = jnp.mean(h, 0, keepdims=True)
    var = jnp.mean((h - mu) ** 2, 0, keepdims=True)
    s = p["bn1_w"] * lax.rsqrt(var + BN_EPS)
    h = jnp.maximum(h * s + (p["bn1_b"] - mu * s), 0.0)

    h2 = h.astype(jnp.bfloat16).astype(f32) @ w2 + p["b2"]
    mu2 = jnp.mean(h2, 0, keepdims=True)
    var2 = jnp.mean((h2 - mu2) ** 2, 0, keepdims=True)
    s2 = p["bn2_w"] * lax.rsqrt(var2 + BN_EPS)
    h2 = jnp.maximum(h2 * s2 + (p["bn2_b"] - mu2 * s2), 0.0)

    return h2 @ p["w3"] + p["b3"]


if __name__ == "__main__":
    # Small shapes consistent with the module (real: 3*100*100 -> 1200 -> 1200 -> 5).
    # Scaled down: 3 x 16 x 16 images (D_in=768), hidden=256, classes=5, batch=8.
    # tk=512 gives a 2-step K grid and exercises the masked ragged-tile path
    # (768 is not a multiple of 512).
    B, SPATIAL, HIDDEN = 8, 16, 256
    D_IN = 3 * SPATIAL * SPATIAL  # 768
    TK = 512

    key = jax.random.PRNGKey(0)
    kx, kp = jax.random.split(key)
    x = jax.random.normal(kx, (B, D_IN), jnp.float32)
    params = init_params(kp, D_IN, HIDDEN, TOT_CL, SPATIAL, tk=TK)

    out = jax.block_until_ready(net_forward(x, params, tk=TK))

    ref = _reference(x, params)
    assert out.shape == (B, TOT_CL), out.shape
    max_diff = float(jnp.max(jnp.abs(out - ref)))
    assert jnp.allclose(out, ref, atol=2e-6, rtol=5e-3), (
        "mismatch vs reference; max abs diff = %e" % max_diff)

    print("KERNEL_OK")
</pallas_src>

<mosaic_0001>
module attributes {stable_mosaic.version = 11 : i64} {
  func.func @kernel(%arg0: i32, %arg1: memref<8x512xf32, #tpu.memory_space<vmem>>, %arg2: memref<512x256xbf16, #tpu.memory_space<vmem>>, %arg3: memref<1x256xf32, #tpu.memory_space<vmem>>, %arg4: memref<1x256xf32, #tpu.memory_space<vmem>>, %arg5: memref<256x256xbf16, #tpu.memory_space<vmem>>, %arg6: memref<1x256xf32, #tpu.memory_space<vmem>>, %arg7: memref<1x256xf32, #tpu.memory_space<vmem>>, %arg8: memref<256x128xf32, #tpu.memory_space<vmem>>, %arg9: memref<1x128xf32, #tpu.memory_space<vmem>>, %arg10: memref<8x128xf32, #tpu.memory_space<vmem>>, %arg11: memref<8x256xf32, #tpu.memory_space<vmem>>) attributes {dimension_semantics = [#tpu.dimension_semantics<arbitrary>], iteration_bounds = array<i64: 2>, scalar_prefetch = 0 : i64, scratch_operands = 1 : i64, tpu.core_type = #tpu.core_type<tc>, window_params = [{transform_indices = @transform_0, window_bounds = array<i64: 8, 512>}, {transform_indices = @transform_1, window_bounds = array<i64: 512, 256>}, {pipeline_mode = #tpu.pipeline_mode<synchronous>, transform_indices = @transform_2, window_bounds = array<i64: 1, 256>}, {pipeline_mode = #tpu.pipeline_mode<synchronous>, transform_indices = @transform_3, window_bounds = array<i64: 1, 256>}, {pipeline_mode = #tpu.pipeline_mode<synchronous>, transform_indices = @transform_4, window_bounds = array<i64: 256, 256>}, {pipeline_mode = #tpu.pipeline_mode<synchronous>, transform_indices = @transform_5, window_bounds = array<i64: 1, 256>}, {pipeline_mode = #tpu.pipeline_mode<synchronous>, transform_indices = @transform_6, window_bounds = array<i64: 1, 256>}, {pipeline_mode = #tpu.pipeline_mode<synchronous>, transform_indices = @transform_7, window_bounds = array<i64: 256, 128>}, {pipeline_mode = #tpu.pipeline_mode<synchronous>, transform_indices = @transform_8, window_bounds = array<i64: 1, 128>}, {pipeline_mode = #tpu.pipeline_mode<synchronous>, transform_indices = @transform_9, window_bounds = array<i64: 8, 128>}]} {
    %c0_i32 = arith.constant 0 : i32
    %0 = arith.cmpi eq, %arg0, %c0_i32 : i32
    %1 = arith.extui %0 : i1 to i32
    %c0_i32_0 = arith.constant 0 : i32
    %2 = arith.cmpi ne, %1, %c0_i32_0 : i32
    scf.if %2 {
      %cst_10 = arith.constant 0.000000e+00 : f32
      %21 = vector.broadcast %cst_10 : f32 to vector<8x256xf32>
      %c0_11 = arith.constant 0 : index
      %c0_12 = arith.constant 0 : index
      %22 = vector.load %arg11[%c0_11, %c0_12] : memref<8x256xf32, #tpu.memory_space<vmem>>, vector<8x256xf32>
      tpu.vector_store %arg11[%c0_11, %c0_12], %21 {strides = array<i32>} : memref<8x256xf32, #tpu.memory_space<vmem>>, vector<8x256xf32>,
    } else {
    }
    %c0 = arith.constant 0 : index
    %c0_1 = arith.constant 0 : index
    %3 = vector.load %arg1[%c0, %c0_1] : memref<8x512xf32, #tpu.memory_space<vmem>>, vector<8x512xf32>
    %c512_i32 = arith.constant 512 : i32
    %4 = arith.muli %arg0, %c512_i32 : i32
    %5 = tpu.iota {dimensions = array<i32: 1>} : vector<8x512xi32>
    %6 = vector.broadcast %4 : i32 to vector<8x512xi32>
    %7 = arith.addi %6, %5 : vector<8x512xi32>
    %c768_i32 = arith.constant 768 : i32
    %8 = vector.broadcast %c768_i32 : i32 to vector<8x512xi32>
    %9 = arith.cmpi slt, %7, %8 : vector<8x512xi32>
    %cst = arith.constant 0.000000e+00 : f32
    %10 = vector.broadcast %cst : f32 to vector<8x512xf32>
    %11 = arith.select %9, %3, %10 : vector<8x512xi1>, vector<8x512xf32>
    %c0_2 = arith.constant 0 : index
    %c0_3 = arith.constant 0 : index
    %12 = vector.load %arg11[%c0_2, %c0_3] : memref<8x256xf32, #tpu.memory_space<vmem>>, vector<8x256xf32>
    %13 = arith.truncf %11 : vector<8x512xf32> to vector<8x512xbf16>
    %c0_4 = arith.constant 0 : index
    %c0_5 = arith.constant 0 : index
    %14 = vector.load %arg2[%c0_4, %c0_5] : memref<512x256xbf16, #tpu.memory_space<vmem>>, vector<512x256xbf16>
    %cst_6 = arith.constant dense<0.000000e+00> : vector<8x256xf32>
    %15 = tpu.matmul %13, %14, %cst_6 {dimension_numbers = #tpu.dot_dimension_numbers<[1], [0], [0], [1], [0, 0, 1, 1], [], []>} : vector<8x512xbf16>, vector<512x256xbf16>, vector<8x256xf32> -> vector<8x256xf32>
    %16 = arith.addf %12, %15 : vector<8x256xf32>
    %c0_7 = arith.constant 0 : index
    %c0_8 = arith.constant 0 : index
    %17 = vector.load %arg11[%c0_7, %c0_8] : memref<8x256xf32, #tpu.memory_space<vmem>>, vector<8x256xf32>
    tpu.vector_store %arg11[%c0_7, %c0_8], %16 {strides = array<i32>} : memref<8x256xf32, #tpu.memory_space<vmem>>, vector<8x256xf32>,
    %c1_i32 = arith.constant 1 : i32
    %18 = arith.cmpi eq, %arg0, %c1_i32 : i32
    %19 = arith.extui %18 : i1 to i32
    %c0_i32_9 = arith.constant 0 : i32
    %20 = arith.cmpi ne, %19, %c0_i32_9 : i32
    scf.if %20 {
      %c0_10 = arith.constant 0 : index
      %c0_11 = arith.constant 0 : index
      %21 = vector.load %arg11[%c0_10, %c0_11] : memref<8x256xf32, #tpu.memory_space<vmem>>, vector<8x256xf32>
      %cst_12 = arith.constant dense<0.000000e+00> : vector<256xf32>
      %22 = vector.multi_reduction <add>, %21, %cst_12 [0] : vector<8x256xf32> to vector<256xf32>
      %23 = vector.shape_cast %22 : vector<256xf32> to vector<1x256xf32>
      %cst_13 = arith.constant 8.000000e+00 : f32
      %24 = vector.broadcast %cst_13 : f32 to vector<1x256xf32>
      %25 = arith.divf %23, %24 : vector<1x256xf32>
      %26 = vector.broadcast %25 : vector<1x256xf32> to vector<8x256xf32>
      %27 = arith.subf %21, %26 : vector<8x256xf32>
      %28 = arith.mulf %27, %27 : vector<8x256xf32>
      %cst_14 = arith.constant dense<0.000000e+00> : vector<256xf32>
      %29 = vector.multi_reduction <add>, %28, %cst_14 [0] : vector<8x256xf32> to vector<256xf32>
      %30 = vector.shape_cast %29 : vector<256xf32> to vector<1x256xf32>
      %cst_15 = arith.constant 8.000000e+00 : f32
      %31 = vector.broadcast %cst_15 : f32 to vector<1x256xf32>
      %32 = arith.divf %30, %31 : vector<1x256xf32>
      %c0_16 = arith.constant 0 : index
      %c0_17 = arith.constant 0 : index
      %33 = vector.load %arg3[%c0_16, %c0_17] : memref<1x256xf32, #tpu.memory_space<vmem>>, vector<1x256xf32>
      %cst_18 = arith.constant 2.000000e-05 : f32
      %34 = vector.broadcast %cst_18 : f32 to vector<1x256xf32>
      %35 = arith.addf %32, %34 : vector<1x256xf32>
      %36 = math.rsqrt %35 : vector<1x256xf32>
      %37 = arith.mulf %33, %36 : vector<1x256xf32>
      %c0_19 = arith.constant 0 : index
      %c0_20 = arith.constant 0 : index
      %38 = vector.load %arg4[%c0_19, %c0_20] : memref<1x256xf32, #tpu.memory_space<vmem>>, vector<1x256xf32>
      %39 = arith.mulf %25, %37 : vector<1x256xf32>
      %40 = arith.subf %38, %39 : vector<1x256xf32>
      %41 = vector.broadcast %37 : vector<1x256xf32> to vector<8x256xf32>
      %42 = arith.mulf %21, %41 : vector<8x256xf32>
      %43 = vector.broadcast %40 : vector<1x256xf32> to vector<8x256xf32>
      %44 = arith.addf %42, %43 : vector<8x256xf32>
      %cst_21 = arith.constant 0.000000e+00 : f32
      %45 = vector.broadcast %cst_21 : f32 to vector<8x256xf32>
      %46 = arith.maximumf %44, %45 : vector<8x256xf32>
      %47 = arith.truncf %46 : vector<8x256xf32> to vector<8x256xbf16>
      %c0_22 = arith.constant 0 : index
      %c0_23 = arith.constant 0 : index
      %48 = vector.load %arg5[%c0_22, %c0_23] : memref<256x256xbf16, #tpu.memory_space<vmem>>, vector<256x256xbf16>
      %cst_24 = arith.constant dense<0.000000e+00> : vector<8x256xf32>
      %49 = tpu.matmul %47, %48, %cst_24 {dimension_numbers = #tpu.dot_dimension_numbers<[1], [0], [0], [1], [0, 0, 1, 1], [], []>} : vector<8x256xbf16>, vector<256x256xbf16>, vector<8x256xf32> -> vector<8x256xf32>
      %cst_25 = arith.constant dense<0.000000e+00> : vector<256xf32>
      %50 = vector.multi_reduction <add>, %49, %cst_25 [0] : vector<8x256xf32> to vector<256xf32>
      %51 = vector.shape_cast %50 : vector<256xf32> to vector<1x256xf32>
      %cst_26 = arith.constant 8.000000e+00 : f32
      %52 = vector.broadcast %cst_26 : f32 to vector<1x256xf32>
      %53 = arith.divf %51, %52 : vector<1x256xf32>
      %54 = vector.broadcast %53 : vector<1x256xf32> to vector<8x256xf32>
      %55 = arith.subf %49, %54 : vector<8x256xf32>
      %56 = arith.mulf %55, %55 : vector<8x256xf32>
      %cst_27 = arith.constant dense<0.000000e+00> : vector<256xf32>
      %57 = vector.multi_reduction <add>, %56, %cst_27 [0] : vector<8x256xf32> to vector<256xf32>
      %58 = vector.shape_cast %57 : vector<256xf32> to vector<1x256xf32>
      %cst_28 = arith.constant 8.000000e+00 : f32
      %59 = vector.broadcast %cst_28 : f32 to vector<1x256xf32>
      %60 = arith.divf %58, %59 : vector<1x256xf32>
      %c0_29 = arith.constant 0 : index
      %c0_30 = arith.constant 0 : index
      %61 = vector.load %arg6[%c0_29, %c0_30] : memref<1x256xf32, #tpu.memory_space<vmem>>, vector<1x256xf32>
      %cst_31 = arith.constant 2.000000e-05 : f32
      %62 = vector.broadcast %cst_31 : f32 to vector<1x256xf32>
      %63 = arith.addf %60, %62 : vector<1x256xf32>
      %64 = math.rsqrt %63 : vector<1x256xf32>
      %65 = arith.mulf %61, %64 : vector<1x256xf32>
      %c0_32 = arith.constant 0 : index
      %c0_33 = arith.constant 0 : index
      %66 = vector.load %arg7[%c0_32, %c0_33] : memref<1x256xf32, #tpu.memory_space<vmem>>, vector<1x256xf32>
      %67 = arith.mulf %53, %65 : vector<1x256xf32>
      %68 = arith.subf %66, %67 : vector<1x256xf32>
      %69 = vector.broadcast %65 : vector<1x256xf32> to vector<8x256xf32>
      %70 = arith.mulf %49, %69 : vector<8x256xf32>
      %71 = vector.broadcast %68 : vector<1x256xf32> to vector<8x256xf32>
      %72 = arith.addf %70, %71 : vector<8x256xf32>
      %cst_34 = arith.constant 0.000000e+00 : f32
      %73 = vector.broadcast %cst_34 : f32 to vector<8x256xf32>
      %74 = arith.maximumf %72, %73 : vector<8x256xf32>
      %c0_35 = arith.constant 0 : index
      %c0_36 = arith.constant 0 : index
      %75 = vector.load %arg8[%c0_35, %c0_36] : memref<256x128xf32, #tpu.memory_space<vmem>>, vector<256x128xf32>
      %cst_37 = arith.constant dense<0.000000e+00> : vector<8x128xf32>
      %76 = tpu.matmul %74, %75, %cst_37 {dimension_numbers = #tpu.dot_dimension_numbers<[1], [0], [0], [1], [0, 0, 1, 1], [], []>} : vector<8x256xf32>, vector<256x128xf32>, vector<8x128xf32> -> vector<8x128xf32>
      %c0_38 = arith.constant 0 : index
      %c0_39 = arith.constant 0 : index
      %77 = vector.load %arg9[%c0_38, %c0_39] : memref<1x128xf32, #tpu.memory_space<vmem>>, vector<1x128xf32>
      %78 = vector.broadcast %77 : vector<1x128xf32> to vector<8x128xf32>
      %79 = arith.addf %76, %78 : vector<8x128xf32>
      %c0_40 = arith.constant 0 : index
      %c0_41 = arith.constant 0 : index
      %80 = vector.load %arg10[%c0_40, %c0_41] : memref<8x128xf32, #tpu.memory_space<vmem>>, vector<8x128xf32>
      tpu.vector_store %arg10[%c0_40, %c0_41], %79 {strides = array<i32>} : memref<8x128xf32, #tpu.memory_space<vmem>>, vector<8x128xf32>,
    } else {
    }
    return
  }
  func.func @transform_0(%arg0: i32) -> (i32, i32) {
    %c0_i32 = arith.constant 0 : i32
    %c0_i32_0 = arith.constant 0 : i32
    return %c0_i32, %arg0 : i32, i32
  }
  func.func @transform_1(%arg0: i32) -> (i32, i32) {
    %c0_i32 = arith.constant 0 : i32
    %c0_i32_0 = arith.constant 0 : i32
    return %arg0, %c0_i32 : i32, i32
  }
  func.func @transform_2(%arg0: i32) -> (i32, i32) {
    %c0_i32 = arith.constant 0 : i32
    %c0_i32_0 = arith.constant 0 : i32
    %c0_i32_1 = arith.constant 0 : i32
    return %c0_i32, %c0_i32_0 : i32, i32
  }
  func.func @transform_3(%arg0: i32) -> (i32, i32) {
    %c0_i32 = arith.constant 0 : i32
    %c0_i32_0 = arith.constant 0 : i32
    %c0_i32_1 = arith.constant 0 : i32
    return %c0_i32, %c0_i32_0 : i32, i32
  }
  func.func @transform_4(%arg0: i32) -> (i32, i32) {
    %c0_i32 = arith.constant 0 : i32
    %c0_i32_0 = arith.constant 0 : i32
    %c0_i32_1 = arith.constant 0 : i32
    return %c0_i32, %c0_i32_0 : i32, i32
  }
  func.func @transform_5(%arg0: i32) -> (i32, i32) {
    %c0_i32 = arith.constant 0 : i32
    %c0_i32_0 = arith.constant 0 : i32
    %c0_i32_1 = arith.constant 0 : i32
    return %c0_i32, %c0_i32_0 : i32, i32
  }
  func.func @transform_6(%arg0: i32) -> (i32, i32) {
    %c0_i32 = arith.constant 0 : i32
    %c0_i32_0 = arith.constant 0 : i32
    %c0_i32_1 = arith.constant 0 : i32
    return %c0_i32, %c0_i32_0 : i32, i32
  }
  func.func @transform_7(%arg0: i32) -> (i32, i32) {
    %c0_i32 = arith.constant 0 : i32
    %c0_i32_0 = arith.constant 0 : i32
    %c0_i32_1 = arith.constant 0 : i32
    return %c0_i32, %c0_i32_0 : i32, i32
  }
  func.func @transform_8(%arg0: i32) -> (i32, i32) {
    %c0_i32 = arith.constant 0 : i32
    %c0_i32_0 = arith.constant 0 : i32
    %c0_i32_1 = arith.constant 0 : i32
    return %c0_i32, %c0_i32_0 : i32, i32
  }
  func.func @transform_9(%arg0: i32) -> (i32, i32) {
    %c0_i32 = arith.constant 0 : i32
    %c0_i32_0 = arith.constant 0 : i32
    %c0_i32_1 = arith.constant 0 : i32
    return %c0_i32, %c0_i32_0 : i32, i32
  }
}

</mosaic_0001>

<bundles_post_ra>
// kernel: tpu_custom_call.1
= control target key start
LH: loop header
LB: loop body
LE: loop exit
PB: predicated region body
PF: predicated region fallthrough
CT: control target
= control target key end

     0   :  { %14 = vsyncpa [#allocation4], 0  ;;  %s2651_s0 = inlined_call_operand.hbm [shape: f32[8,768], index: 0, kind: input, shape index: {}]   ;;  %s2652_s1 = inlined_call_operand.hbm [shape: bf16[1024,256], index: 1, kind: input, shape index: {}]   ;;  %s2653_s2 = inlined_call_operand.vmem [shape: f32[1,256], index: 2, kind: input, shape index: {}]   ;;  %s2654_s3 = inlined_call_operand.vmem [shape: f32[1,256], index: 3, kind: input, shape index: {}]   ;;  %s2655_s4 = inlined_call_operand.hbm [shape: bf16[256,256], index: 4, kind: input, shape index: {}]   ;;  %s2656_s5 = inlined_call_operand.vmem [shape: f32[1,256], index: 5, kind: input, shape index: {}]   ;;  %s2657_s6 = inlined_call_operand.vmem [shape: f32[1,256], index: 6, kind: input, shape index: {}]   ;;  %s2658_s7 = inlined_call_operand.hbm [shape: f32[256,128], index: 7, kind: input, shape index: {}]   ;;  %s2659_s8 = inlined_call_operand.vmem [shape: f32[1,128], index: 8, kind: input, shape index: {}]   ;;  %s2660_s9 = inlined_call_operand.hbm [shape: f32[8,128], index: 9, kind: output, shape index: {}]  }
   0x1   :  { %16 = vsyncpa [#allocation4 + $0x1], 0 }
   0x2   :  { %17 = vsyncpa [#allocation7], 0 }
   0x3   :  { %19 = vsyncpa [#allocation7 + $0x1], 0 }
   0x4   :  { %20 = vsyncpa [#allocation10], 0 }
   0x5   :  { %21 = vsyncpa [#allocation5], 0  ;;  %s2266_s30 = smov 0   ;;  %s2268_s10 = smov 0  }
   0x6   :  { %s2270_s11 = smov 0   ;;  %s2272_s12 = smov 0  }
   0x7 LB: > { %s2285_s13 = sadd.s32 4294967295, %s2203_s12   ;;  %s2288_s14 = sadd.s32 1, %s2203_s12   ;;  %s2203_s12 = sphi %s2272_s12, %s2682_s12   ;;  %s2199_s11 = sphi %s2270_s11, %s2686_s11   ;;  %s2195_s10 = sphi %s2268_s10, %s2685_s10   ;;  %s2191_s30 = sphi %s2266_s30, %s2684_s30  }
   0x8   : > { %2667 = sst [smem:[#allocation17_spill]] %s2288_s14  ;;  %s31_s15 = ssub.s32 %s2203_s12, %s2288_s14 }
   0x9   : > { %s34_s16 = sadd.s32 1, %s2199_s11  ;;  %p32_p0 = scmp.eq.s32.totalorder %s31_s15, 0 }
   0xa   : > { %p41_p1 = scmp.ne.s32.totalorder %s2199_s11, %s2195_s10  ;;  %p42_p2 = scmp.eq.s32.totalorder %s2203_s12, 0 }
   0xb   : > { %p47_p3 = scmp.ne.s32.totalorder %s2195_s10, %s2191_s30  ;;  %p2661_p5 = scmp.eq.s32.totalorder %s2285_s13, 0 }
   0xc   : > { %s2298_s17 = scalar_select %p32_p0, %s2199_s11, %s34_s16  }
   0xd   : > { %p2300_p4 = por %p42_p2, %p41_p1  ;;  %p1588_p6 = scmp.ge.s32.totalorder %s2203_s12, 1 }
   0xe   : > { %2668 = sst [smem:[#allocation18_spill]] %s2298_s17  ;;  %p252_p7 = scmp.lt.s32.totalorder %s2203_s12, 3 }
   0xf   : > { %s2669_s18 = scalar_select %p2300_p4, 1, 0 }
  0x10   : > { %p2309_p8 = por %p2661_p5, %p47_p3  ;;  %p2314_p10 = pnand %p1588_p6, %p252_p7 }
  0x11   : > { %s2205_s21 = smov [#allocation8]   ;;  %s2206_s24 = smov [#allocation9]  }
  0x12   : > { %s2670_s19 = scalar_select %p2309_p8, 1, 0 }
  0x13   : > { %s2671_s20 = scalar_select %p2314_p10, 1, 0 }
  0x14   : > { %s270_s22 = sshll.u32 %s2205_s21, 4  ;;  %p1809_p11 = pneg %p2314_p10  ;;  %s271_s22 = int_to_ptr.vmem [resolvable:$true] %s270_s22 }
  0x15   : > { %s289_s25 = sshll.u32 %s2206_s24, 4  ;;  %s2015_s28 = scalar_lea.hbm %s2655_s4, 4096  ;;  %s2326_s25 = int_to_ptr.vmem [resolvable:$true] %s289_s25 }
  0x16   : > { %p2322_p12 = pnand %p1809_p11, %p2661_p5  ;;  %p2016_p13 = scmp.ne.s32.totalorder %s2655_s4, %s2015_s28 }
  0x17   : > { %p2022_p3 = scmp.lt.u32.totalorder %s2015_s28, %s2655_s4 }
  0x18   : > { %p2017_p0 = pneg %p2322_p12 }
  0x1a   : > { %p2018_p1 = pnand %p2017_p0, %p2016_p13 }
  0x1c   : > { %p2019_p2 = pneg %p2018_p1 }
  0x1e   : > { %p2024_p6 = pnand %p2022_p3, %p2019_p2 }
  0x20   : > { %2027 = shalt.err (!%p2024_p6)
}
  0x21   : > { %s2028_s21 = scalar_lea.vmem %s271_s22, 4096  ;;  %p2036_p5 = scmp.lt.s32.totalorder %s271_s22, %s271_s22 }
  0x22   : > { %p2029_p7 = scmp.ne.s32.totalorder %s271_s22, %s2028_s21  ;;  %p2037_p8 = scmp.lt.s32.totalorder %s2028_s21, %s2028_s21 }
  0x24   : > { %p2031_p11 = pnand %p2029_p7, %p2017_p0  ;;  %p2038_p10 = por %p2037_p8, %p2036_p5 }
  0x26   : > { %p2032_p9 = pneg %p2031_p11 }
  0x28   : > { %p2039_p4 = pnand %p2038_p10, %p2032_p9 }
  0x2a   : > { %2042 = shalt.err (!%p2039_p4)
}
  0x2b   : > { %s2207_s24 = smov 128   ;;  %s2208_s26 = smov 8  }
  0x2c   : > { %1812 = dma.hbm_to_vmem [thread:$0]  (!%p2322_p12), %s2655_s4, 4096, %s271_s22, [#allocation7], %s2207_s24, %s2207_s24, %s2208_s26  }
  0x2d   : > { %s2043_s15 = scalar_lea.hbm %s2658_s7, 4096 }
  0x2e   : > { %p2044_p13 = scmp.ne.s32.totalorder %s2658_s7, %s2043_s15  ;;  %p2050_p8 = scmp.lt.u32.totalorder %s2043_s15, %s2658_s7 }
  0x30   : > { %p2046_p4 = pnand %p2044_p13, %p2017_p0 }
  0x32   : > { %p2047_p5 = pneg %p2046_p4 }
  0x34   : > { %p2052_p9 = pnand %p2050_p8, %p2047_p5 }
  0x36   : > { %2055 = shalt.err (!%p2052_p9)
}
  0x37   : > { %s2056_s22 = scalar_lea.vmem %s2326_s25, 4096  ;;  %p2064_p3 = scmp.lt.s32.totalorder %s2326_s25, %s2326_s25 }
  0x38   : > { %p2057_p10 = scmp.ne.s32.totalorder %s2326_s25, %s2056_s22  ;;  %p2065_p6 = scmp.lt.s32.totalorder %s2056_s22, %s2056_s22 }
  0x3a   : > { %p2059_p1 = pnand %p2057_p10, %p2017_p0  ;;  %p2066_p7 = por %p2065_p6, %p2064_p3 }
  0x3c   : > { %p2060_p2 = pneg %p2059_p1 }
  0x3e   : > { %p2067_p11 = pnand %p2066_p7, %p2060_p2 }
  0x40   : > { %2070 = shalt.err (!%p2067_p11)
}
  0x41   : > { %1815 = dma.hbm_to_vmem [thread:$0]  (!%p2322_p12), %s2658_s7, 4096, %s2326_s25, [#allocation10], %s2207_s24, %s2207_s24, %s2208_s26  }
  0x42   : > { %p1591_p13 = scmp.ge.s32.totalorder %s2203_s12, 2 }
  0x43   : > { %p2673_p4 = scmp.ne.s32.totalorder (!%p1591_p13), %s2669_s18, 0 }
  0x44   : > { %302 = sbr.rel (%p1591_p13) target bundleno = 136 (0x88), region = 44 }
  0x4b   : > { %305 = sbr.rel (!%p2673_p4) target bundleno = 109 (0x6d), region = 48  ;;  %s306_s27 = sand.u32 (%p2673_p4), 1, %s2199_s11  }
  0x4c   : > { %s1593_s28 = sshll.u32 (%p2673_p4), %s2203_s12, 2  ;;  %s1592_s29 = sshll.u32 (%p2673_p4), %s306_s27, 5 }
  0x4d   : > { %s312_s30 = ssub.s32 (%p2673_p4), 6, %s1593_s28  ;;  %s2383_s16 = scalar_lea.sflag (%p2673_p4), [#allocation4], %s306_s27 }
  0x4e   : > { %p313_p0 = scmp.lt.s32.totalorder (%p2673_p4), %s312_s30, 4  ;;  %s310_s25 = scalar_lea.vmem (%p2673_p4), [#allocation3], %s1592_s29 }
  0x52   : > { %s2688_s30 = smov (!%p313_p0, %s312_s30), 4 }
  0x53   : > { %s2380_s23 = sshll.u32 %s2688_s30, 7 }
  0x54   : > { %s317_s15 = ssub.s32 512, %s2380_s23 }
  0x55   : > { %318 = vsyncadd %s2383_s16, %s317_s15  ;;  %p1595_p12 = scmp.ne.s32.totalorder %s2380_s23, 0  ;;  %s1724_s24 = sshll.u32 %s2203_s12, 9 }
  0x56   : > { %s2391_s22 = scalar_lea.hbm %s2651_s0, %s1724_s24  ;;  %s324_s14 = sshll.u32 %s310_s25, 4  ;;  %s325_s14 = int_to_ptr.vmem [resolvable:$true] %s324_s14 }
  0x57   : > { %s2071_s17 = scalar_lea.hbm %s2391_s22, %s2380_s23  ;;  %s2075_s29 = scalar_lea.hbm %s2651_s0, 768 }
  0x58   : > { %p2072_p5 = scmp.ne.s32.totalorder %s2391_s22, %s2071_s17  ;;  %p2076_p10 = scmp.lt.u32.totalorder %s2391_s22, %s2651_s0 }
  0x59   : > { %p2077_p1 = scmp.lt.u32.totalorder %s2075_s29, %s2071_s17  ;;  %p2079_p3 = scmp.lt.u32.totalorder %s2071_s17, %s2391_s22 }
  0x5a   : > { %p2073_p8 = pnand %p2072_p5, %p1595_p12 }
  0x5b   : > { %p2078_p2 = por %p2077_p1, %p2076_p10 }
  0x5c   : > { %p2074_p9 = pneg %p2073_p8 }
  0x5d   : > { %p2080_p6 = por %p2079_p3, %p2078_p2 }
  0x5f   : > { %p2081_p7 = pnand %p2080_p6, %p2074_p9 }
  0x61   : > { %2084 = shalt.err (!%p2081_p7)
}
  0x62   : > { %s2085_s25 = scalar_lea.vmem %s325_s14, %s2380_s23  ;;  %s2209_s24 = smov [#allocation3]  }
  0x63   : > { %p2086_p11 = scmp.ne.s32.totalorder %s325_s14, %s2085_s25  ;;  %s2089_s26 = sshll.u32 %s2209_s24, 4  ;;  %s2090_s26 = int_to_ptr.vmem [resolvable:$false] %s2089_s26 }
  0x64   : > { %s2091_s21 = scalar_lea.vmem %s2090_s26, 1024  ;;  %p2092_p0 = scmp.lt.s32.totalorder %s325_s14, %s2090_s26 }
  0x65   : > { %p2087_p13 = pnand %p2086_p11, %p1595_p12  ;;  %p2093_p5 = scmp.lt.s32.totalorder %s2091_s21, %s2085_s25 }
  0x67   : > { %p2088_p4 = pneg %p2087_p13  ;;  %p2094_p8 = por %p2093_p5, %p2092_p0 }
  0x69   : > { %p2095_p1 = pnand %p2094_p8, %p2088_p4 }
  0x6b   : > { %2098 = shalt.err (!%p2095_p1)
}
  0x6c   : > { %327 = dma.hbm_to_vmem [thread:$0]  (%p1595_p12), %s2391_s22, %s2380_s23, %s325_s14, %s2383_s16  }
  0x6d PF: > { %s331_s17 = sand.u32 1, %s2203_s12   ;;  %s333_s27 = sand.u32 1, %s2199_s11  }
  0x6e   : > { %s1599_s28 = sshll.u32 %s333_s27, 9  ;;  %s1726_s29 = sshll.u32 %s2203_s12, 13 }
  0x6f   : > { %s2420_s25 = scalar_lea.hbm %s2652_s1, %s1726_s29  ;;  %s335_s24 = scalar_lea.vmem [#allocation6], %s1599_s28 }
  0x70   : > { %s343_s23 = sshll.u32 %s335_s24, 4  ;;  %s2424_s16 = scalar_lea.sflag [#allocation7], %s331_s17  ;;  %s2422_s23 = int_to_ptr.vmem [resolvable:$true] %s343_s23 }
  0x71   : > { %s2099_s22 = scalar_lea.hbm %s2420_s25, 8192  ;;  %p2674_p9 = scmp.ne.s32.totalorder %s2669_s18, 0 }
  0x72   : > { %p2100_p12 = scmp.ne.s32.totalorder %s2420_s25, %s2099_s22  ;;  %s2103_s26 = scalar_lea.hbm %s2652_s1, 16384 }
  0x73   : > { %p2104_p3 = scmp.lt.u32.totalorder %s2420_s25, %s2652_s1  ;;  %p2105_p6 = scmp.lt.u32.totalorder %s2103_s26, %s2099_s22 }
  0x74   : > { %p2101_p10 = pnand %p2100_p12, %p2674_p9  ;;  %p2107_p11 = scmp.lt.u32.totalorder %s2099_s22, %s2420_s25 }
  0x75   : > { %p2106_p7 = por %p2105_p6, %p2104_p3 }
  0x76   : > { %p2102_p2 = pneg %p2101_p10 }
  0x77   : > { %p2108_p13 = por %p2107_p11, %p2106_p7 }
  0x79   : > { %p2109_p4 = pnand %p2108_p13, %p2102_p2 }
  0x7b   : > { %2112 = shalt.err (!%p2109_p4)
}
  0x7c   : > { %s2113_s17 = scalar_lea.vmem %s2422_s23, 8192  ;;  %s2210_s28 = smov [#allocation6]  }
  0x7d   : > { %p2114_p0 = scmp.ne.s32.totalorder %s2422_s23, %s2113_s17  ;;  %s2117_s29 = sshll.u32 %s2210_s28, 4  ;;  %s2118_s29 = int_to_ptr.vmem [resolvable:$false] %s2117_s29 }
  0x7e   : > { %s2119_s30 = scalar_lea.vmem %s2118_s29, 16384  ;;  %p2120_p1 = scmp.lt.s32.totalorder %s2422_s23, %s2118_s29 }
  0x7f   : > { %p2115_p5 = pnand %p2114_p0, %p2674_p9  ;;  %p2121_p12 = scmp.lt.s32.totalorder %s2119_s30, %s2113_s17 }
  0x81   : > { %p2116_p8 = pneg %p2115_p5  ;;  %p2122_p10 = por %p2121_p12, %p2120_p1 }
  0x83   : > { %p2123_p3 = pnand %p2122_p10, %p2116_p8 }
  0x85   : > { %2126 = shalt.err (!%p2123_p3)
}
  0x86   : > { %s2211_s15 = smov 128   ;;  %s2212_s24 = smov 8  }
  0x87   : > { %1798 = dma.hbm_to_vmem [thread:$0]  (%p2674_p9), %s2420_s25, 8192, %s2422_s23, %s2424_s16, %s2211_s15, %s2211_s15, %s2212_s24  }
  0x88 PF: > { %p2675_p2 = scmp.ne.s32.totalorder %s2671_s20, 0 }
  0x89   : > { %s357_s22 = sand.u32 (!%p2675_p2), 1, %s2195_s10   ;;  %p2676_p6 = scmp.ne.s32.totalorder (!%p2675_p2), %s2670_s19, 0 }
  0x8a   : > { %355 = sbr.rel (%p2675_p2) target bundleno = 1058 (0x422), region = 56  ;;  %s1604_s12 = sshll.u32 (!%p2675_p2), %s357_s22, 5 }
  0x8b   : > { %s358_s14 = scalar_lea.sflag (!%p2675_p2), [#allocation4], %s357_s22  ;;  %s2451_s26 = scalar_lea.vmem (!%p2675_p2), [#allocation3], %s1604_s12 }
  0x91   : > { %2170 = dma.done.wait (%p2676_p6), %s358_s14, 512  }
  0x92   : > { %2172 = vsyncadd (%p2676_p6), %s358_s14, 4294966784  ;;  %s366_s18 = sand.u32 1, %s2285_s13   ;;  %s1605_s25 = sshll.u32 %s357_s22, 9 }
  0x93   : > { %s367_s23 = scalar_lea.sflag [#allocation7], %s366_s18  ;;  %s2458_s16 = scalar_lea.vmem [#allocation6], %s1605_s25 }
  0x94   : > { %2174 = dma.done.wait (%p2676_p6), %s367_s23, 8192  }
  0x95   : > { %2176 = vsyncadd (%p2676_p6), %s367_s23, 4294959104  ;;  %p2677_p9 = scmp.eq.s32.totalorder %s2285_s13, 0 }
  0x97   : > { %2178 = dma.done.wait (%p2677_p9), [#allocation7], 4096   ;;  %p2678_p7 = pmov %p2677_p9 }
  0x99   : > { %2180 = vsyncadd (%p2678_p7), [#allocation7], 4294963200  ;;  %p2679_p11 = pmov %p2678_p7 }
  0x9a   : > { %p2680_p13 = pmov %p2678_p7 }
  0x9b   : > { %2182 = dma.done.wait (%p2679_p11), [#allocation10], 4096  }
  0x9c   : > { %2184 = vsyncadd (%p2680_p13), [#allocation10], 4294963200  ;;  %p2681_p4 = scmp.ne.s32.totalorder %s2285_s13, 0 }
  0x9d   : > { %v2213_v0 = vmov (!%p2681_p4), 0.0  }
  0x9e   : > { %422 = sbr.rel (%p2681_p4) target bundleno = 165 (0xa5), region = 76  ;;  %423 = vst [vmem:[#allocation2] sm:$0xff] (!%p2681_p4), %v2213_v0  ;;  %424 = vst [vmem:[#allocation2 + $0x8] sm:$0xff] (!%p2681_p4), %v2213_v0 }
  0xa5 PF: > { %v1863_v1 = vld [vmem:[%s2458_s16 + $0x4] ss:$8 sps:$4 sm:$0xff]   ;;  %v1867_v3 = vld [vmem:[%s2458_s16] ss:$8 sps:$4 sm:$0xff]   ;;  %v1869_v5 = vld [vmem:[%s2458_s16 + $0x14] ss:$8 sps:$4 sm:$0xff]   ;;  %v430_v30 = vlaneseq }
  0xa6   : > { %v1865_v2 = vld [vmem:[%s2458_s16 + $0x104] ss:$8 sps:$4 sm:$0xff]   ;;  %838 = vmatprep.subr.bf16.mxu0 %v1863_v1  ;;  %v1868_v4 = vld [vmem:[%s2458_s16 + $0x100] ss:$8 sps:$4 sm:$0xff]   ;;  %v1871_v6 = vld [vmem:[%s2458_s16 + $0x114] ss:$8 sps:$4 sm:$0xff]  }
  0xa7   : > { %879 = vmatprep.subr.bf16.mxu1 %v1865_v2  ;;  %839 = vmatpush1.bf16.msra.mxu0 %v1867_v3  ;;  %v1873_v7 = vld [vmem:[%s2458_s16 + $0x10] ss:$8 sps:$4 sm:$0xff]   ;;  %v1875_v9 = vld [vmem:[%s2458_s16 + $0x24] ss:$8 sps:$4 sm:$0xff]   ;;  %v1879_v11 = vld [vmem:[%s2458_s16 + $0x20] ss:$8 sps:$4 sm:$0xff]  }
  0xa8   : > { %880 = vmatpush1.bf16.msra.mxu1 %v1868_v4  ;;  %840 = vmatprep.subr.bf16.mxu0 %v1869_v5  ;;  %v1874_v8 = vld [vmem:[%s2458_s16 + $0x110] ss:$8 sps:$4 sm:$0xff]   ;;  %v1877_v10 = vld [vmem:[%s2458_s16 + $0x124] ss:$8 sps:$4 sm:$0xff]   ;;  %v1880_v12 = vld [vmem:[%s2458_s16 + $0x120] ss:$8 sps:$4 sm:$0xff]  }
  0xa9   : > { %881 = vmatprep.subr.bf16.mxu1 %v1871_v6  ;;  %v1881_v13 = vld [vmem:[%s2458_s16 + $0x34] ss:$8 sps:$4 sm:$0xff]   ;;  %v1885_v15 = vld [vmem:[%s2458_s16 + $0x30] ss:$8 sps:$4 sm:$0xff]   ;;  %v1887_v17 = vld [vmem:[%s2458_s16 + $0x44] ss:$8 sps:$4 sm:$0xff]  }
  0xaa   : > { %v1883_v14 = vld [vmem:[%s2458_s16 + $0x134] ss:$8 sps:$4 sm:$0xff]   ;;  %v1886_v16 = vld [vmem:[%s2458_s16 + $0x130] ss:$8 sps:$4 sm:$0xff]   ;;  %v1889_v18 = vld [vmem:[%s2458_s16 + $0x144] ss:$8 sps:$4 sm:$0xff]  }
  0xab   : > { %841 = vmatpush1.bf16.msra.mxu0 %v1873_v7  ;;  %v1891_v19 = vld [vmem:[%s2458_s16 + $0x40] ss:$8 sps:$4 sm:$0xff]   ;;  %v1893_v21 = vld [vmem:[%s2458_s16 + $0x54] ss:$8 sps:$4 sm:$0xff]   ;;  %v1897_v23 = vld [vmem:[%s2458_s16 + $0x50] ss:$8 sps:$4 sm:$0xff]  }
  0xac   : > { %882 = vmatpush1.bf16.msra.mxu1 %v1874_v8  ;;  %842 = vmatprep.subr.bf16.mxu0 %v1875_v9  ;;  %v1892_v20 = vld [vmem:[%s2458_s16 + $0x140] ss:$8 sps:$4 sm:$0xff]   ;;  %v1895_v22 = vld [vmem:[%s2458_s16 + $0x154] ss:$8 sps:$4 sm:$0xff]   ;;  %v1898_v24 = vld [vmem:[%s2458_s16 + $0x150] ss:$8 sps:$4 sm:$0xff]  }
  0xad   : > { %883 = vmatprep.subr.bf16.mxu1 %v1877_v10  ;;  %v1899_v25 = vld [vmem:[%s2458_s16 + $0x64] ss:$8 sps:$4 sm:$0xff]   ;;  %v1903_v27 = vld [vmem:[%s2458_s16 + $0x60] ss:$8 sps:$4 sm:$0xff]   ;;  %v1905_v29 = vld [vmem:[%s2458_s16 + $0x74] ss:$8 sps:$4 sm:$0xff]  }
  0xae   : > { %v1901_v26 = vld [vmem:[%s2458_s16 + $0x164] ss:$8 sps:$4 sm:$0xff]   ;;  %v1904_v28 = vld [vmem:[%s2458_s16 + $0x160] ss:$8 sps:$4 sm:$0xff]   ;;  %v1907_v31 = vld [vmem:[%s2458_s16 + $0x174] ss:$8 sps:$4 sm:$0xff]  }
  0xaf   : > { %843 = vmatpush1.bf16.msra.mxu0 %v1879_v11  ;;  %v1909_v32 = vld [vmem:[%s2458_s16 + $0x70] ss:$8 sps:$4 sm:$0xff]   ;;  %v1911_v34 = vld [vmem:[%s2458_s16 + $0x84] ss:$8 sps:$4 sm:$0xff]   ;;  %v2508_v35 = vand.u32 127, %v430_v30  ;;  %s1609_s19 = sshll.u32 %s2285_s13, 9 }
  0xb0   : > { %884 = vmatpush1.bf16.msra.mxu1 %v1880_v12  ;;  %844 = vmatprep.subr.bf16.mxu0 %v1881_v13  ;;  %v1910_v33 = vld [vmem:[%s2458_s16 + $0x170] ss:$8 sps:$4 sm:$0xff]   ;;  %v1913_v36 = vld [vmem:[%s2458_s16 + $0x184] ss:$8 sps:$4 sm:$0xff]   ;;  %v1915_v37 = vld [vmem:[%s2458_s16 + $0x80] ss:$8 sps:$4 sm:$0xff]   ;;  %v2517_v42 = vstv %s1609_s19 }
  0xb1   : > { %885 = vmatprep.subr.bf16.mxu1 %v1883_v14  ;;  %v1916_v38 = vld [vmem:[%s2458_s16 + $0x180] ss:$8 sps:$4 sm:$0xff]   ;;  %v1917_v39 = vld [vmem:[%s2458_s16 + $0x94] ss:$8 sps:$4 sm:$0xff]   ;;  %v432_v40 = vadd.s32 128, %v2508_v35  ;;  %v434_v43 = vadd.s32 384, %v2508_v35  ;;  %v436_v9 = vadd.s32 %v2517_v42, %v2508_v35 }
  0xb2   : > { %v1919_v41 = vld [vmem:[%s2458_s16 + $0x194] ss:$8 sps:$4 sm:$0xff]   ;;  %v1921_v44 = vld [vmem:[%s2458_s16 + $0x90] ss:$8 sps:$4 sm:$0xff]   ;;  %v1923_v46 = vld [vmem:[%s2458_s16 + $0xa4] ss:$8 sps:$4 sm:$0xff]  }
  0xb3   : > { %845 = vmatpush1.bf16.msra.mxu0 %v1885_v15  ;;  %v1922_v45 = vld [vmem:[%s2458_s16 + $0x190] ss:$8 sps:$4 sm:$0xff]   ;;  %v437_v47 = vadd.s32 %v2517_v42, %v432_v40  ;;  %v1925_v48 = vld [vmem:[%s2458_s16 + $0x1a4] ss:$8 sps:$4 sm:$0xff]   ;;  %v439_v49 = vadd.s32 %v2517_v42, %v434_v43  ;;  %v1927_v50 = vld [vmem:[%s2458_s16 + $0xa0] ss:$8 sps:$4 sm:$0xff]  }
  0xb4   : > { %886 = vmatpush1.bf16.msra.mxu1 %v1886_v16  ;;  %846 = vmatprep.subr.bf16.mxu0 %v1887_v17  ;;  %v1928_v51 = vld [vmem:[%s2458_s16 + $0x1a0] ss:$8 sps:$4 sm:$0xff]   ;;  %v1929_v52 = vld [vmem:[%s2458_s16 + $0xb4] ss:$8 sps:$4 sm:$0xff]   ;;  %v1933_v57 = vld [vmem:[%s2458_s16 + $0xb0] ss:$8 sps:$4 sm:$0xff]  }
  0xb5   : > { %887 = vmatprep.subr.bf16.mxu1 %v1889_v18  ;;  %vm441_vm0 = vcmp.lt.s32.totalorder %v437_v47, 768  ;;  %v1931_v53 = vld [vmem:[%s2458_s16 + $0x1b4] ss:$8 sps:$4 sm:$0xff]   ;;  %vm443_vm1 = vcmp.lt.s32.totalorder %v439_v49, 768  ;;  %v426_v54 = vld [vmem:[%s2451_s26 + $0x8] sm:$0xff]  ;;  %v433_v6 = vadd.s32 256, %v2508_v35 }
  0xb6   : > { %vm1674_vm2 = vmpackc.low %vm441_vm0, %vm441_vm0  ;;  %v1675_v55 = vpack.c.bf16 %v426_v54, %v426_v54  ;;  %v428_v56 = vld [vmem:[%s2451_s26 + $0x18] sm:$0xff]  ;;  %v1935_v60 = vld [vmem:[%s2458_s16 + $0xc4] ss:$8 sps:$4 sm:$0xff]   ;;  %vm440_vm4 = vcmp.lt.s32.totalorder %v436_v9, 768  ;;  %p1686_p0 = scmp.ne.s32.totalorder %s2285_s13, 1 }
  0xb7   : > { %847 = vmatpush1.bf16.msra.mxu0 %v1891_v19  ;;  %v1934_v58 = vld [vmem:[%s2458_s16 + $0x1b0] ss:$8 sps:$4 sm:$0xff]   ;;  %vm1680_vm3 = vmpackc.low %vm443_vm1, %vm443_vm1  ;;  %v1681_v59 = vpack.c.bf16 %v428_v56, %v428_v56  ;;  %v1937_v61 = vld [vmem:[%s2458_s16 + $0x1c4] ss:$8 sps:$4 sm:$0xff]   ;;  %v438_v12 = vadd.s32 %v2517_v42, %v433_v6 }
  0xb8   : > { %888 = vmatpush1.bf16.msra.mxu1 %v1892_v20  ;;  %848 = vmatprep.subr.bf16.mxu0 %v1893_v21  ;;  %v1939_v62 = vld [vmem:[%s2458_s16 + $0xc0] ss:$8 sps:$4 sm:$0xff]   ;;  %v1941_v0 = vld [vmem:[%s2458_s16 + $0xd4] ss:$8 sps:$4 sm:$0xff]   ;;  %v1945_v2 = vld [vmem:[%s2458_s16 + $0xd0] ss:$8 sps:$4 sm:$0xff]  }
  0xb9   : > { %889 = vmatprep.subr.bf16.mxu1 %v1895_v22  ;;  %1676 = vmatprep.mubr.msk.bf16.mxu0 %vm1674_vm2, %v1675_v55  ;;  %v1940_v63 = vld [vmem:[%s2458_s16 + $0x1c0] ss:$8 sps:$4 sm:$0xff]   ;;  %v1943_v1 = vld [vmem:[%s2458_s16 + $0x1d4] ss:$8 sps:$4 sm:$0xff]   ;;  %v1946_v3 = vld [vmem:[%s2458_s16 + $0x1d0] ss:$8 sps:$4 sm:$0xff]  }
  0xba   : > { %1682 = vmatprep.mubr.msk.bf16.mxu1 %vm1680_vm3, %v1681_v59  ;;  %v1947_v4 = vld [vmem:[%s2458_s16 + $0xe4] ss:$8 sps:$4 sm:$0xff]   ;;  %v1951_v7 = vld [vmem:[%s2458_s16 + $0xe0] ss:$8 sps:$4 sm:$0xff]   ;;  %v1953_v10 = vld [vmem:[%s2458_s16 + $0xf4] ss:$8 sps:$4 sm:$0xff]  }
  0xbb   : > { %849 = vmatpush1.bf16.msra.mxu0 %v1897_v23  ;;  %v1949_v5 = vld [vmem:[%s2458_s16 + $0x1e4] ss:$8 sps:$4 sm:$0xff]   ;;  %v1952_v8 = vld [vmem:[%s2458_s16 + $0x1e0] ss:$8 sps:$4 sm:$0xff]   ;;  %v1955_v11 = vld [vmem:[%s2458_s16 + $0x1f4] ss:$8 sps:$4 sm:$0xff]  }
  0xbc   : > { %890 = vmatpush1.bf16.msra.mxu1 %v1898_v24  ;;  %850 = vmatprep.subr.bf16.mxu0 %v1899_v25  ;;  %v1957_v13 = vld [vmem:[%s2458_s16 + $0xf0] ss:$8 sps:$4 sm:$0xff]   ;;  %v425_v15 = vld [vmem:[%s2451_s26] sm:$0xff]  ;;  %vm442_vm5 = vcmp.lt.s32.totalorder %v438_v12, 768  ;;  %vm1677_vm6 = vmpackc.low %vm440_vm4, %vm440_vm4 }
  0xbd   : > { %891 = vmatprep.subr.bf16.mxu1 %v1901_v26  ;;  %v1958_v14 = vld [vmem:[%s2458_s16 + $0x1f0] ss:$8 sps:$4 sm:$0xff]   ;;  %v1678_v17 = vpack.c.bf16 %v425_v15, %v425_v15  ;;  %vm1683_vm7 = vmpackc.low %vm442_vm5, %vm442_vm5  ;;  %v1961_v35 = vld [vmem:[#allocation8] ss:$8 sps:$4 sm:$0xff] (!%p1686_p0)  }
  0xbe   : > { %v427_v16 = vld [vmem:[%s2451_s26 + $0x10] sm:$0xff]  ;;  %v449_v24 = vld [vmem:[#allocation2 + $0x8] sm:$0xff]  ;;  %v1971_v42 = vld [vmem:[#allocation8 + $0x44] ss:$8 sps:$4 sm:$0xff] (!%p1686_p0)  }
  0xbf   : > { %851 = vmatpush1.bf16.msra.mxu0 %v1903_v27  ;;  %v1684_v18 = vpack.c.bf16 %v427_v16, %v427_v16  ;;  %v448_v20 = vld [vmem:[#allocation2] sm:$0xff]  ;;  %v1973_v43 = vld [vmem:[#allocation8 + $0x40] ss:$8 sps:$4 sm:$0xff] (!%p1686_p0)   ;;  %v1989_v6 = vld [vmem:[#allocation8 + $0xa4] ss:$8 sps:$4 sm:$0xff] (!%p1686_p0)  }
  0xc0   : > { %892 = vmatpush1.bf16.msra.mxu1 %v1904_v28  ;;  %852 = vmatprep.subr.bf16.mxu0 %v1905_v29  ;;  %v1968_v40 = vld [vmem:[#allocation8 + $0x34] ss:$8 sps:$4 sm:$0xff] (!%p1686_p0)  }
  0xc1   : > { %893 = vmatprep.subr.bf16.mxu1 %v1907_v31  ;;  %v1992_v12 = vld [vmem:[#allocation8 + $0xb4] ss:$8 sps:$4 sm:$0xff] (!%p1686_p0)  }
  0xc3   : > { %853 = vmatpush1.bf16.msra.mxu0 %v1909_v32 }
  0xc4   : > { %894 = vmatpush1.bf16.msra.mxu1 %v1910_v33  ;;  %854 = vmatprep.subr.bf16.mxu0 %v1911_v34  ;;  %v1959_v34 = vld [vmem:[#allocation8 + $0x4] ss:$8 sps:$4 sm:$0xff] (!%p1686_p0)  }
  0xc5   : > { %895 = vmatprep.subr.bf16.mxu1 %v1913_v36  ;;  %v1962_v36 = vld [vmem:[#allocation8 + $0x14] ss:$8 sps:$4 sm:$0xff] (!%p1686_p0)  }
  0xc7   : > { %855 = vmatpush1.bf16.msra.mxu0 %v1915_v37  ;;  %v1964_v37 = vld [vmem:[#allocation8 + $0x10] ss:$8 sps:$4 sm:$0xff] (!%p1686_p0)  }
  0xc8   : > { %896 = vmatpush1.bf16.msra.mxu1 %v1916_v38  ;;  %856 = vmatprep.subr.bf16.mxu0 %v1917_v39  ;;  %v1965_v38 = vld [vmem:[#allocation8 + $0x24] ss:$8 sps:$4 sm:$0xff] (!%p1686_p0)   ;;  %v1967_v39 = vld [vmem:[#allocation8 + $0x20] ss:$8 sps:$4 sm:$0xff] (!%p1686_p0)  }
  0xc9   : > { %897 = vmatprep.subr.bf16.mxu1 %v1919_v41  ;;  %v1970_v41 = vld [vmem:[#allocation8 + $0x30] ss:$8 sps:$4 sm:$0xff] (!%p1686_p0)  }
  0xcb   : > { %857 = vmatpush1.bf16.msra.mxu0 %v1921_v44  ;;  %v1974_v44 = vld [vmem:[#allocation8 + $0x54] ss:$8 sps:$4 sm:$0xff] (!%p1686_p0)  }
  0xcc   : > { %898 = vmatpush1.bf16.msra.mxu1 %v1922_v45  ;;  %858 = vmatprep.subr.bf16.mxu0 %v1923_v46  ;;  %v1976_v45 = vld [vmem:[#allocation8 + $0x50] ss:$8 sps:$4 sm:$0xff] (!%p1686_p0)   ;;  %v1977_v46 = vld [vmem:[#allocation8 + $0x64] ss:$8 sps:$4 sm:$0xff] (!%p1686_p0)  }
  0xcd   : > { %899 = vmatprep.subr.bf16.mxu1 %v1925_v48 }
  0xcf   : > { %859 = vmatpush1.bf16.msra.mxu0 %v1927_v50 }
  0xd0   : > { %900 = vmatpush1.bf16.msra.mxu1 %v1928_v51  ;;  %860 = vmatprep.subr.bf16.mxu0 %v1929_v52  ;;  %v1979_v51 = vld [vmem:[#allocation8 + $0x60] ss:$8 sps:$4 sm:$0xff] (!%p1686_p0)   ;;  %v1980_v52 = vld [vmem:[#allocation8 + $0x74] ss:$8 sps:$4 sm:$0xff] (!%p1686_p0)  }
  0xd1   : > { %901 = vmatprep.subr.bf16.mxu1 %v1931_v53 }
  0xd3   : > { %861 = vmatpush1.bf16.msra.mxu0 %v1933_v57  ;;  %v1982_v57 = vld [vmem:[#allocation8 + $0x70] ss:$8 sps:$4 sm:$0xff] (!%p1686_p0)  }
  0xd4   : > { %902 = vmatpush1.bf16.msra.mxu1 %v1934_v58  ;;  %862 = vmatprep.subr.bf16.mxu0 %v1935_v60  ;;  %v1983_v58 = vld [vmem:[#allocation8 + $0x84] ss:$8 sps:$4 sm:$0xff] (!%p1686_p0)  }
  0xd5   : > { %903 = vmatprep.subr.bf16.mxu1 %v1937_v61 }
  0xd7   : > { %863 = vmatpush1.bf16.msra.mxu0 %v1939_v62 }
  0xd8   : > { %904 = vmatpush1.bf16.msra.mxu1 %v1940_v63  ;;  %864 = vmatprep.subr.bf16.mxu0 %v1941_v0  ;;  %v1985_v63 = vld [vmem:[#allocation8 + $0x80] ss:$8 sps:$4 sm:$0xff] (!%p1686_p0)   ;;  %v1986_v0 = vld [vmem:[#allocation8 + $0x94] ss:$8 sps:$4 sm:$0xff] (!%p1686_p0)  }
  0xd9   : > { %905 = vmatprep.subr.bf16.mxu1 %v1943_v1 }
  0xdb   : > { %865 = vmatpush1.bf16.msra.mxu0 %v1945_v2 }
  0xdc   : > { %906 = vmatpush1.bf16.msra.mxu1 %v1946_v3  ;;  %866 = vmatprep.subr.bf16.mxu0 %v1947_v4 }
  0xdd   : > { %907 = vmatprep.subr.bf16.mxu1 %v1949_v5  ;;  %v1988_v5 = vld [vmem:[#allocation8 + $0x90] ss:$8 sps:$4 sm:$0xff] (!%p1686_p0)  }
  0xdf   : > { %867 = vmatpush1.bf16.msra.mxu0 %v1951_v7 }
  0xe0   : > { %908 = vmatpush1.bf16.msra.mxu1 %v1952_v8  ;;  %868 = vmatprep.subr.bf16.mxu0 %v1953_v10 }
  0xe1   : > { %909 = vmatprep.subr.bf16.mxu1 %v1955_v11  ;;  %v1991_v11 = vld [vmem:[#allocation8 + $0xa0] ss:$8 sps:$4 sm:$0xff] (!%p1686_p0)  }
  0xe3   : > { %869 = vmatpush1.bf16.msra.mxu0 %v1957_v13 }
  0xe4   : > { %910 = vmatpush1.bf16.msra.mxu1 %v1958_v14  ;;  %1231 = vmatprep.subr.bf16.mxu0 (!%p1686_p0), %v1959_v34 }
  0xe6   : > { %1679 = vmatmul.mubr.msk.bf16.vlgmr.msra.gmra.mrb[0].mxu0 %vm1677_vm6, %v1678_v17  ;;  %v1994_v17 = vld [vmem:[#allocation8 + $0xb0] ss:$8 sps:$4 sm:$0xff] (!%p1686_p0)  }
  0xe7   : > { %1685 = vmatmul.mubr.msk.bf16.vlgmr.msra.gmra.mrb[0].mxu1 %vm1683_vm7, %v1684_v18  ;;  %1232 = vmatpush1.bf16.msra.mxu0 (!%p1686_p0), %v1961_v35  ;;  %v1995_v18 = vld [vmem:[#allocation8 + $0xc4] ss:$8 sps:$4 sm:$0xff] (!%p1686_p0)  }
  0xe8   : > { %1233 = vmatprep.subr.bf16.mxu0 (!%p1686_p0), %v1962_v36  ;;  %v2003_v36 = vld [vmem:[#allocation8 + $0xe0] ss:$8 sps:$4 sm:$0xff] (!%p1686_p0)  }
  0xeb   : > { %1234 = vmatpush1.bf16.msra.mxu0 (!%p1686_p0), %v1964_v37  ;;  %v2004_v37 = vld [vmem:[#allocation8 + $0xf4] ss:$8 sps:$4 sm:$0xff] (!%p1686_p0)  }
  0xec   : > { %1235 = vmatprep.subr.bf16.mxu0 (!%p1686_p0), %v1965_v38  ;;  %v2214_v38 = vmov (!%p1686_p0), 1966171168  }
  0xef   : > { %1236 = vmatpush1.bf16.msra.mxu0 (!%p1686_p0), %v1967_v39  ;;  %v972_v39 = vunpack.c.l.s4 (!%p1686_p0), %v2214_v38  ;;  %v1405_v38 = vld [vmem:[#allocation9 + $0xd8] sm:$0xff] (!%p1686_p0) }
  0xf0   : > { %1237 = vmatprep.subr.bf16.mxu0 (!%p1686_p0), %v1968_v40  ;;  %v2006_v40 = vld [vmem:[#allocation8 + $0xf0] ss:$8 sps:$4 sm:$0xff] (!%p1686_p0)  }
  0xf3   : > { %1238 = vmatpush1.bf16.msra.mxu0 (!%p1686_p0), %v1970_v41  ;;  %v973_v41 = vunpack.c.0.s8 (!%p1686_p0), %v972_v39 }
  0xf4   : > { %1239 = vmatprep.subr.bf16.mxu0 (!%p1686_p0), %v1971_v42  ;;  %v975_v42 = vshrl.u32 (!%p1686_p0), %v430_v30, 7 }
  0xf7   : > { %1240 = vmatpush1.bf16.msra.mxu0 (!%p1686_p0), %v1973_v43 }
  0xf8   : > { %1241 = vmatprep.subr.bf16.mxu0 (!%p1686_p0), %v1974_v44  ;;  %v2574_v44 = vsub.s32 (!%p1686_p0), %v973_v41, %v975_v42  ;;  %v1388_v41 = vld [vmem:[#allocation9 + $0x50] sm:$0xff] (!%p1686_p0) }
  0xfb   : > { %1242 = vmatpush1.bf16.msra.mxu0 (!%p1686_p0), %v1976_v45 }
  0xfc   : > { %1243 = vmatprep.subr.bf16.mxu0 (!%p1686_p0), %v1977_v46 }
  0xff   : > { %1244 = vmatpush1.bf16.msra.mxu0 (!%p1686_p0), %v1979_v51 }
 0x100   : > { %1245 = vmatprep.subr.bf16.mxu0 (!%p1686_p0), %v1980_v52  ;;  %v2581_v52 = vsub.s32 (!%p1686_p0), 0, %v975_v42 }
 0x103   : > { %1246 = vmatpush1.bf16.msra.mxu0 (!%p1686_p0), %v1982_v57 }
 0x104   : > { %1247 = vmatprep.subr.bf16.mxu0 (!%p1686_p0), %v1983_v58 }
 0x107   : > { %1248 = vmatpush1.bf16.msra.mxu0 (!%p1686_p0), %v1985_v63 }
 0x108   : > { %1249 = vmatprep.subr.bf16.mxu0 (!%p1686_p0), %v1986_v0 }
 0x10b   : > { %1250 = vmatpush1.bf16.msra.mxu0 (!%p1686_p0), %v1988_v5 }
 0x10c   : > { %1251 = vmatprep.subr.bf16.mxu0 (!%p1686_p0), %v1989_v6 }
 0x10f   : > { %1252 = vmatpush1.bf16.msra.mxu0 (!%p1686_p0), %v1991_v11  ;;  %v1378_v11 = vld [vmem:[#allocation9] sm:$0xff] (!%p1686_p0) }
 0x110   : > { %1253 = vmatprep.subr.bf16.mxu0 (!%p1686_p0), %v1992_v12 }
 0x113   : > { %1254 = vmatpush1.bf16.msra.mxu0 (!%p1686_p0), %v1994_v17  ;;  %v1381_v17 = vld [vmem:[#allocation9 + $0x18] sm:$0xff] (!%p1686_p0) }
 0x114   : > { %1255 = vmatprep.subr.bf16.mxu0 (!%p1686_p0), %v1995_v18  ;;  %v1398_v18 = vld [vmem:[#allocation9 + $0xa0] sm:$0xff] (!%p1686_p0) }
 0x1b9   : > { %v872_v19 = vpop.f32.mrb[0].mxu0 }
 0x1ba   : > { %v913_v21 = vpop.f32.mrb[0].mxu1  ;;  %v874_v23 = vpop.f32.mrb[1].mxu0  ;;  %927 = sbr.rel (%p1686_p0) target bundleno = 1033 (0x409), region = 80 }
 0x1bb   : > { %v914_v22 = vadd.f32 %v913_v21, %v872_v19  ;;  %v915_v25 = vpop.f32.mrb[1].mxu1  ;;  %v876_v27 = vpop.f32.mrb[2].mxu0 }
 0x1bc   : > { %v916_v26 = vadd.f32 %v915_v25, %v874_v23  ;;  %v917_v28 = vpop.f32.mrb[2].mxu1  ;;  %v877_v31 = vpop.f32.mrb[3].mxu0  ;;  %v1997_v23 = vld [vmem:[#allocation8 + $0xc0] ss:$8 sps:$4 sm:$0xff] (!%p1686_p0)  }
 0x1bd   : > { %v920_v29 = vadd.f32 %v914_v22, %v448_v20  ;;  %v918_v32 = vpop.f32.mrb[3].mxu1  ;;  %1256 = vmatpush1.bf16.msra.mxu0 (!%p1686_p0), %v1997_v23  ;;  %v2001_v31 = vld [vmem:[#allocation8 + $0xe4] ss:$8 sps:$4 sm:$0xff] (!%p1686_p0)  }
 0x1be   : > { %v921_v33 = vadd.f32 %v916_v26, %v449_v24  ;;  %v1998_v24 = vld [vmem:[#allocation8 + $0xd4] ss:$8 sps:$4 sm:$0xff] (!%p1686_p0)   ;;  %v1383_v23 = vld [vmem:[#allocation9 + $0x28] sm:$0xff] (!%p1686_p0) }
 0x1bf   : > { %922 = vst [vmem:[#allocation2] sm:$0xff] %v920_v29  ;;  %v2000_v29 = vld [vmem:[#allocation8 + $0xd0] ss:$8 sps:$4 sm:$0xff] (!%p1686_p0)   ;;  %1257 = vmatprep.subr.bf16.mxu0 (!%p1686_p0), %v1998_v24 }
 0x1c0   : > { %923 = vst [vmem:[#allocation2 + $0x8] sm:$0xff] %v921_v33  ;;  %v1400_v24 = vld [vmem:[#allocation9 + $0xb0] sm:$0xff] (!%p1686_p0) }
 0x1c1   : > { %1258 = vmatpush1.bf16.msra.mxu0 %v2000_v29  ;;  %v1385_v29 = vld [vmem:[#allocation9 + $0x38] sm:$0xff] }
 0x1c2   : > { %1259 = vmatprep.subr.bf16.mxu0 %v2001_v31  ;;  %v1402_v31 = vld [vmem:[#allocation9 + $0xc0] sm:$0xff] }
 0x1c5   : > { %1260 = vmatpush1.bf16.msra.mxu0 %v2003_v36  ;;  %v1387_v36 = vld [vmem:[#allocation9 + $0x48] sm:$0xff] }
 0x1c6   : > { %v2557_v47 = vld [vmem:[#allocation2] sm:$0xff]  ;;  %1261 = vmatprep.subr.bf16.mxu0 %v2004_v37 }
 0x1c7   : > { %v2559_v48 = vld [vmem:[#allocation2 + $0x8] sm:$0xff]  ;;  %v930_v49 = vrot.slane %v2557_v47, 4  ;;  %v1404_v37 = vld [vmem:[#allocation9 + $0xd0] sm:$0xff] }
 0x1c8   : > { %v936_v50 = vrot.slane %v2559_v48, 4 }
 0x1c9   : > { %v931_v53 = vadd.f32 %v930_v49, %v2557_v47  ;;  %1262 = vmatpush1.bf16.msra.mxu0 %v2006_v40  ;;  %v1782_v40 = vpack.c.bf16 %v1405_v38, %v1404_v37  ;;  %v1304_v37 = vld [vmem:[%s2656_s5] sm:$0x3] }
 0x1ca   : > { %v937_v54 = vadd.f32 %v936_v50, %v2559_v48  ;;  %v963_v50 = vld [vmem:[%s2653_s2] sm:$0x3] }
 0x1cb   : > { %v932_v55 = vrot.slane %v931_v53, 2 }
 0x1cc   : > { %v938_v56 = vrot.slane %v937_v54, 2 }
 0x1cd   : > { %v933_v59 = vadd.f32 %v932_v55, %v931_v53  ;;  %v2583_v53 = vsub.s32 1, %v975_v42  ;;  %v1389_v42 = vld [vmem:[#allocation9 + $0x58] sm:$0xff] }
 0x1ce   : > { %v939_v60 = vadd.f32 %v938_v56, %v937_v54 }
 0x1cf   : > { %v934_v61 = vrot.slane %v933_v59, 1 }
 0x1d0   : > { %v940_v62 = vrot.slane %v939_v60, 1 }
 0x1d1   : > { %v935_v1 = vadd.f32 %v934_v61, %v933_v59 }
 0x1d2   : > { %v941_v2 = vadd.f32 %v940_v62, %v939_v60  ;;  %v987_v60 = vld [vmem:[%s2654_s3] sm:$0x3] }
 0x1d3   : > { %v2565_v3 = vmul.f32 0.125, %v935_v1 }
 0x1d4   : > { %v2567_v4 = vmul.f32 0.125, %v941_v2 }
 0x1d5   : > { %v945_v7 = vsub.f32 %v2557_v47, %v2565_v3 }
 0x1d6   : > { %v946_v8 = vsub.f32 %v2559_v48, %v2567_v4 }
 0x1d7   : > { %v947_v9 = vmul.f32 %v945_v7, %v945_v7 }
 0x1d8   : > { %v948_v10 = vmul.f32 %v946_v8, %v946_v8 }
 0x1d9   : > { %v949_v13 = vrot.slane %v947_v9, 4 }
 0x1da   : > { %v955_v14 = vrot.slane %v948_v10, 4 }
 0x1db   : > { %v950_v15 = vadd.f32 %v949_v13, %v947_v9  ;;  %v1394_v9 = vld [vmem:[#allocation9 + $0x80] sm:$0xff]  ;;  %v1379_v13 = vld [vmem:[#allocation9 + $0x8] sm:$0xff] }
 0x1dc   : > { %v956_v16 = vadd.f32 %v955_v14, %v948_v10  ;;  %v1395_v10 = vld [vmem:[#allocation9 + $0x88] sm:$0xff]  ;;  %v1397_v14 = vld [vmem:[#allocation9 + $0x98] sm:$0xff] }
 0x1dd   : > { %v951_v19 = vrot.slane %v950_v15, 2  ;;  %v1762_v12 = vpack.c.bf16 %v1395_v10, %v1394_v9 }
 0x1de   : > { %v957_v20 = vrot.slane %v956_v16, 2 }
 0x1df   : > { %v952_v21 = vadd.f32 %v951_v19, %v950_v15  ;;  %1763 = vmatprep.subr.bf16.mxu1 %v1762_v12  ;;  %v1399_v19 = vld [vmem:[#allocation9 + $0xa8] sm:$0xff] }
 0x1e0   : > { %v958_v22 = vadd.f32 %v957_v20, %v956_v16  ;;  %v1380_v16 = vld [vmem:[#allocation9 + $0x10] sm:$0xff] }
 0x1e1   : > { %v953_v25 = vrot.slane %v952_v21, 1  ;;  %v1768_v20 = vpack.c.bf16 %v1381_v17, %v1380_v16 }
 0x1e2   : > { %v959_v26 = vrot.slane %v958_v22, 1 }
 0x1e3   : > { %v954_v27 = vadd.f32 %v953_v25, %v952_v21  ;;  %v1770_v21 = vpack.c.bf16 %v1399_v19, %v1398_v18  ;;  %v1401_v25 = vld [vmem:[#allocation9 + $0xb8] sm:$0xff] }
 0x1e4   : > { %v960_v28 = vadd.f32 %v959_v26, %v958_v22  ;;  %v1382_v22 = vld [vmem:[#allocation9 + $0x20] sm:$0xff] }
 0x1e5   : > { %v961_v32 = vmul.f32 0.125, %v954_v27  ;;  %v1772_v26 = vpack.c.bf16 %v1383_v23, %v1382_v22  ;;  %v1774_v27 = vpack.c.bf16 %v1401_v25, %v1400_v24 }
 0x1e6   : > { %v962_v33 = vmul.f32 0.125, %v960_v28  ;;  %v1384_v28 = vld [vmem:[#allocation9 + $0x30] sm:$0xff] }
 0x1e7   : > { %v964_v34 = vadd.f32 2e-05, %v961_v32  ;;  %v1403_v32 = vld [vmem:[#allocation9 + $0xc8] sm:$0xff] }
 0x1e8   : > { %v965_v35 = vadd.f32 2e-05, %v962_v33  ;;  %v1776_v33 = vpack.c.bf16 %v1385_v29, %v1384_v28 }
 0x1e9   : > { %2007 = vrsqrt.f32 %v964_v34  ;;  %v1778_v34 = vpack.c.bf16 %v1403_v32, %v1402_v31 }
 0x1ea   : > { %2009 = vrsqrt.f32 %v965_v35  ;;  %v1386_v35 = vld [vmem:[#allocation9 + $0x40] sm:$0xff] }
 0x1eb   : > { %v1780_v39 = vpack.c.bf16 %v1387_v36, %v1386_v35 }
 0x1f3   : > { %v2008_v43 = vpop.eup %2007 }
 0x1f4   : > { %v2010_v45 = vpop.eup %2009 }
 0x1f5   : > { %v970_v46 = vcombine.low %v2008_v43, %v2010_v45  ;;  %v1406_v43 = vld [vmem:[#allocation9 + $0xe0] sm:$0xff]  ;;  %v1407_v45 = vld [vmem:[#allocation9 + $0xe8] sm:$0xff] }
 0x1f7   : > { %v977_v49 = vrot.slane %v970_v46, %v2574_v44  ;;  %v1784_v46 = vpack.c.bf16 %v1389_v42, %v1388_v41 }
 0x1f9   : > { %v984_v51 = vrot.slane %v977_v49, %v2574_v44  ;;  %v1786_v49 = vpack.c.bf16 %v1407_v45, %v1406_v43 }
 0x1fb   : > { %v986_v54 = vmul.f32 %v984_v51, %v963_v50  ;;  %v1390_v50 = vld [vmem:[#allocation9 + $0x60] sm:$0xff]  ;;  %v1391_v51 = vld [vmem:[#allocation9 + $0x68] sm:$0xff] }
 0x1fd   : > { %v992_v30 = vrot.slane %v986_v54, %v2581_v52  ;;  %v996_v55 = vrot.slane %v986_v54, %v2583_v53  ;;  %v1408_v54 = vld [vmem:[#allocation9 + $0xf0] sm:$0xff] }
 0x1ff   : > { %v999_v56 = vmul.f32 %v992_v30, %v2565_v3  ;;  %v1000_v57 = vmul.f32 %v996_v55, %v2567_v4  ;;  %v1021_v63 = vmul.f32 %v996_v55, %v2559_v48  ;;  %v1020_v0 = vmul.f32 %v992_v30, %v2557_v47  ;;  %v1396_v48 = vld [vmem:[#allocation9 + $0x90] sm:$0xff]  ;;  %v1409_v30 = vld [vmem:[#allocation9 + $0xf8] sm:$0xff] }
 0x200   : > { %v1764_v47 = vpack.c.bf16 %v1379_v13, %v1378_v11  ;;  %v1766_v15 = vpack.c.bf16 %v1397_v14, %v1396_v48  ;;  %v1788_v55 = vpack.c.bf16 %v1391_v51, %v1390_v50  ;;  %v1328_v51 = vld [vmem:[%s2657_s6] sm:$0x3] }
 0x201   : > { %v1003_v58 = vcombine.low %v999_v56, %v1000_v57  ;;  %v1790_v56 = vpack.c.bf16 %v1409_v30, %v1408_v54  ;;  %v1392_v57 = vld [vmem:[#allocation9 + $0x70] sm:$0xff] }
 0x202   : > { %1765 = vmatpush3.bf16.msra.mxu1 %v1764_v47 }
 0x203   : > { %v1010_v59 = vrot.slane %v1003_v58, %v2574_v44  ;;  %1767 = vmatprep.subr.bf16.mxu1 %v1766_v15  ;;  %v1393_v58 = vld [vmem:[#allocation9 + $0x78] sm:$0xff] }
 0x205   : > { %v1017_v61 = vrot.slane %v1010_v59, %v2574_v44  ;;  %v1792_v59 = vpack.c.bf16 %v1393_v58, %v1392_v57 }
 0x206   : > { %1769 = vmatpush3.bf16.msra.mxu1 %v1768_v20 }
 0x207   : > { %v1019_v62 = vsub.f32 %v987_v60, %v1017_v61  ;;  %1771 = vmatprep.subr.bf16.mxu1 %v1770_v21 }
 0x209   : > { %v1030_v1 = vrot.slane %v1019_v62, %v2583_v53  ;;  %v1026_v2 = vrot.slane %v1019_v62, %v2581_v52 }
 0x20a   : > { %1773 = vmatpush3.bf16.msra.mxu1 %v1772_v26 }
 0x20b   : > { %v1034_v3 = vadd.f32 %v1030_v1, %v1021_v63  ;;  %v1033_v4 = vadd.f32 %v1026_v2, %v1020_v0  ;;  %1775 = vmatprep.subr.bf16.mxu1 %v1774_v27 }
 0x20d   : > { %v1036_v5 = vmax.f32 %v1034_v3, 0.0  ;;  %v1035_v6 = vmax.f32 %v1033_v4, 0.0 }
 0x20e   : > { %1777 = vmatpush3.bf16.msra.mxu1 %v1776_v33 }
 0x20f   : > { %v1038_v7 = vpack.c.bf16 %v1036_v5, %v1036_v5  ;;  %v1037_v8 = vpack.c.bf16 %v1035_v6, %v1035_v6  ;;  %1779 = vmatprep.subr.bf16.mxu1 %v1778_v34 }
 0x211   : > { %1263 = vmatprep.mubr.bf16.mxu0 %v1038_v7 }
 0x212   : > { %1264 = vmatmul.mubr.bf16.vlgmr.msra.gmra.mrb[0].mxu0 %v1037_v8  ;;  %1781 = vmatpush3.bf16.msra.mxu1 %v1780_v39 }
 0x213   : > { %1783 = vmatprep.subr.bf16.mxu1 %v1782_v40 }
 0x216   : > { %1785 = vmatpush3.bf16.msra.mxu1 %v1784_v46 }
 0x217   : > { %1787 = vmatprep.subr.bf16.mxu1 %v1786_v49 }
 0x21a   : > { %1789 = vmatpush3.bf16.msra.mxu1 %v1788_v55 }
 0x21b   : > { %1791 = vmatprep.subr.bf16.mxu1 %v1790_v56 }
 0x21e   : > { %1793 = vmatpush3.bf16.msra.mxu1 %v1792_v59 }
 0x2e5   : > { %v1265_v60 = vpop.f32.mrb[0].mxu0 }
 0x2e6   : > { %v1272_v61 = vrot.slane %v1265_v60, 4  ;;  %v1267_v62 = vpop.f32.mrb[1].mxu0 }
 0x2e7   : > { %v1278_v63 = vrot.slane %v1267_v62, 4  ;;  %v1269_v0 = vpop.f32.mrb[2].mxu0 }
 0x2e8   : > { %v1273_v1 = vadd.f32 %v1272_v61, %v1265_v60  ;;  %v1270_v2 = vpop.f32.mrb[3].mxu0 }
 0x2e9   : > { %v1279_v3 = vadd.f32 %v1278_v63, %v1267_v62 }
 0x2ea   : > { %v1274_v4 = vrot.slane %v1273_v1, 2 }
 0x2eb   : > { %v1280_v5 = vrot.slane %v1279_v3, 2 }
 0x2ec   : > { %v1275_v6 = vadd.f32 %v1274_v4, %v1273_v1 }
 0x2ed   : > { %v1281_v7 = vadd.f32 %v1280_v5, %v1279_v3 }
 0x2ee   : > { %v1276_v8 = vrot.slane %v1275_v6, 1 }
 0x2ef   : > { %v1282_v9 = vrot.slane %v1281_v7, 1 }
 0x2f0   : > { %v1277_v10 = vadd.f32 %v1276_v8, %v1275_v6 }
 0x2f1   : > { %v1283_v11 = vadd.f32 %v1282_v9, %v1281_v7 }
 0x2f2   : > { %v1284_v12 = vmul.f32 0.125, %v1277_v10 }
 0x2f3   : > { %v1285_v13 = vmul.f32 0.125, %v1283_v11 }
 0x2f4   : > { %v1286_v48 = vsub.f32 %v1265_v60, %v1284_v12 }
 0x2f5   : > { %v1287_v14 = vsub.f32 %v1267_v62, %v1285_v13 }
 0x2f6   : > { %v1288_v47 = vmul.f32 %v1286_v48, %v1286_v48 }
 0x2f7   : > { %v1289_v15 = vmul.f32 %v1287_v14, %v1287_v14 }
 0x2f8   : > { %v1290_v16 = vrot.slane %v1288_v47, 4 }
 0x2f9   : > { %v1296_v17 = vrot.slane %v1289_v15, 4 }
 0x2fa   : > { %v1291_v18 = vadd.f32 %v1290_v16, %v1288_v47 }
 0x2fb   : > { %v1297_v19 = vadd.f32 %v1296_v17, %v1289_v15 }
 0x2fc   : > { %v1292_v20 = vrot.slane %v1291_v18, 2 }
 0x2fd   : > { %v1298_v21 = vrot.slane %v1297_v19, 2 }
 0x2fe   : > { %v1293_v22 = vadd.f32 %v1292_v20, %v1291_v18 }
 0x2ff   : > { %v1299_v23 = vadd.f32 %v1298_v21, %v1297_v19 }
 0x300   : > { %v1294_v24 = vrot.slane %v1293_v22, 1 }
 0x301   : > { %v1300_v25 = vrot.slane %v1299_v23, 1 }
 0x302   : > { %v1295_v26 = vadd.f32 %v1294_v24, %v1293_v22 }
 0x303   : > { %v1301_v27 = vadd.f32 %v1300_v25, %v1299_v23 }
 0x304   : > { %v1302_v28 = vmul.f32 0.125, %v1295_v26 }
 0x305   : > { %v1303_v29 = vmul.f32 0.125, %v1301_v27 }
 0x306   : > { %v1305_v31 = vadd.f32 2e-05, %v1302_v28 }
 0x307   : > { %v1306_v32 = vadd.f32 2e-05, %v1303_v29 }
 0x308   : > { %2011 = vrsqrt.f32 %v1305_v31 }
 0x309   : > { %2013 = vrsqrt.f32 %v1306_v32 }
 0x312   : > { %v2012_v33 = vpop.eup %2011 }
 0x313   : > { %v2014_v34 = vpop.eup %2013 }
 0x314   : > { %v1311_v35 = vcombine.low %v2012_v33, %v2014_v34 }
 0x316   : > { %v1318_v36 = vrot.slane %v1311_v35, %v2574_v44 }
 0x318   : > { %v1325_v38 = vrot.slane %v1318_v36, %v2574_v44 }
 0x31a   : > { %v1327_v39 = vmul.f32 %v1325_v38, %v1304_v37 }
 0x31c   : > { %v1333_v40 = vrot.slane %v1327_v39, %v2581_v52  ;;  %v1337_v41 = vrot.slane %v1327_v39, %v2583_v53 }
 0x31e   : > { %v1340_v42 = vmul.f32 %v1333_v40, %v1284_v12  ;;  %v1341_v43 = vmul.f32 %v1337_v41, %v1285_v13  ;;  %v1362_v45 = vmul.f32 %v1337_v41, %v1267_v62  ;;  %v1361_v46 = vmul.f32 %v1333_v40, %v1265_v60  ;;  %v1719_v62 = vld [vmem:[%s2659_s8] ss:$0 sm:$0xff] }
 0x320   : > { %v1344_v49 = vcombine.low %v1340_v42, %v1341_v43 }
 0x322   : > { %v1351_v50 = vrot.slane %v1344_v49, %v2574_v44 }
 0x324   : > { %v1358_v54 = vrot.slane %v1351_v50, %v2574_v44 }
 0x326   : > { %v1360_v30 = vsub.f32 %v1328_v51, %v1358_v54 }
 0x328   : > { %v1371_v55 = vrot.slane %v1360_v30, %v2583_v53  ;;  %v1367_v56 = vrot.slane %v1360_v30, %v2581_v52 }
 0x32a   : > { %v1375_v57 = vadd.f32 %v1371_v55, %v1362_v45  ;;  %v1374_v58 = vadd.f32 %v1367_v56, %v1361_v46 }
 0x32c   : > { %v1377_v59 = vmax.f32 %v1375_v57, 0.0  ;;  %v1376_v61 = vmax.f32 %v1374_v58, 0.0 }
 0x32e   : > { %1481 = vmatprep.mubr.f32.mxu1 %v1377_v59 }
 0x32f   : > { %1482 = vmatmul.mubr.f32.vlgmr.msra.gmra.mrb[0].mxu1 %v1376_v61 }
 0x402   : > { %v1759_v60 = vpop.f32.mrb[0].mxu1 }
 0x403   : > { %v1760_v63 = vpop.f32.mrb[1].mxu1 }
 0x404   : > { %v1761_v0 = vadd.f32 %v1760_v63, %v1759_v60 }
 0x406   : > { %v1484_v1 = vadd.f32 %v1761_v0, %v1719_v62 }
 0x408   : > { %1487 = vst [vmem:[#allocation11] sm:$0xff] %v1484_v1 }
 0x409 PF: > { %p1820_p5 = scmp.eq.s32.totalorder %s2285_s13, 1  ;;  %s2215_s12 = smov [#allocation11]  }
 0x40a   : > { %s1495_s14 = sshll.u32 %s2215_s12, 4  ;;  %s1496_s14 = int_to_ptr.vmem [resolvable:$true] %s1495_s14 }
 0x40b   : > { %s2127_s26 = scalar_lea.vmem %s1496_s14, 128  ;;  %p2134_p10 = scmp.lt.s32.totalorder %s1496_s14, %s1496_s14 }
 0x40c   : > { %p2128_p8 = scmp.ne.s32.totalorder %s1496_s14, %s2127_s26  ;;  %p2135_p3 = scmp.lt.s32.totalorder %s2127_s26, %s2127_s26 }
 0x40e   : > { %p2129_p1 = pnand %p2128_p8, %p1820_p5  ;;  %p2136_p2 = por %p2135_p3, %p2134_p10 }
 0x410   : > { %p2130_p12 = pneg %p2129_p1 }
 0x412   : > { %p2137_p6 = pnand %p2136_p2, %p2130_p12 }
 0x414   : > { %2140 = shalt.err (!%p2137_p6)
}
 0x415   : > { %s2141_s23 = scalar_lea.hbm %s2660_s9, 128 }
 0x416   : > { %p2142_p9 = scmp.ne.s32.totalorder %s2660_s9, %s2141_s23  ;;  %p2147_p13 = scmp.lt.u32.totalorder %s2141_s23, %s2660_s9 }
 0x418   : > { %p2143_p7 = pnand %p2142_p9, %p1820_p5 }
 0x41a   : > { %p2144_p11 = pneg %p2143_p7 }
 0x41c   : > { %p2149_p4 = pnand %p2147_p13, %p2144_p11 }
 0x41e   : > { %2152 = shalt.err (!%p2149_p4)
}
 0x41f   : > { %1806 = dma.vmem_to_hbm [thread:$0]  (%p1820_p5), %s1496_s14, 128, %s2660_s9, [#allocation5]  }
 0x420   : > { %2186 = dma.done.wait (%p1820_p5), [#allocation5], 128  }
 0x421   : > { %2188 = vsyncadd (%p1820_p5), [#allocation5], 4294967168 }
 0x422 PF: > { %s2682_s12 = sld [smem:[#allocation17_spill]]  ;;  %s2683_s28 = sld [smem:[#allocation18_spill]] }
 0x423   : > { %s2684_s30 = smov %s2195_s10  ;;  %s2685_s10 = smov %s2199_s11 }
 0x428   : > { %p24_p0 = scmp.ge.s32.totalorder %s2682_s12, 4   ;;  %s2686_s11 = smov %s2683_s28 }
 0x42a   :  { %26 = sbr.rel (!%p24_p0) target bundleno = 7 (0x7), region = 122 }
 0x431   :  { %1508 = vsyncpa [#allocation4], 1 }
 0x432   :  { %1510 = vsyncpa [#allocation4 + $0x1], 1 }
 0x433   :  { %1511 = vsyncpa [#allocation7], 1 }
 0x434   :  { %1513 = vsyncpa [#allocation7 + $0x1], 1 }
 0x435   :  { %1514 = vsyncpa [#allocation10], 1 }
 0x436   :  { %1515 = vsyncpa [#allocation5], 1 }
 0x437   :  { %1517 = vsyncpa [#allocation5 + $0x1], 1 }

</bundles_post_ra>
